<compile_context>
chip_gen: v5e
topology: v5e:2x2
jax: 0.10.0
libtpu: 0.0.40
codegen_flags: <defaults>
</compile_context>

<pallas_src>
import math

import jax
import jax.numpy as jnp
from jax.experimental import pallas as pl
from jax.experimental.pallas import tpu as pltpu


# ---------------------------------------------------------------------------
# Kernels
# ---------------------------------------------------------------------------
def support_kernel(x_ref, w_ref, s_ref):
    # support row-block = x_rows @ W  (bf16 MXU operands, f32 accumulation).
    # x is cast to bf16 in VMEM -> no separate wrapper-side cast pass.
    s_ref[...] = jnp.dot(
        x_ref[...].astype(jnp.bfloat16),
        w_ref[...],
        preferred_element_type=jnp.float32,
    ).astype(s_ref.dtype)


def aggregate_kernel(adj_ref, s_ref, b_ref, o_ref, acc_ref):
    # output row-block = sum_k adj[rows, kblk] @ support[kblk]  (+ bias at end)
    # adj is streamed in its HBM dtype and cast to bf16 in VMEM (free on VPU
    # while the kernel is DMA-bound on the n^2 adjacency stream).
    k = pl.program_id(1)

    @pl.when(k == 0)
    def _():
        acc_ref[...] = jnp.zeros_like(acc_ref)

    acc_ref[...] += jnp.dot(
        adj_ref[...].astype(jnp.bfloat16),
        s_ref[...],
        preferred_element_type=jnp.float32,
    )

    @pl.when(k == pl.num_programs(1) - 1)
    def _():
        o_ref[...] = (acc_ref[...] + b_ref[...]).astype(o_ref.dtype)


# ---------------------------------------------------------------------------
# Wrapper
# ---------------------------------------------------------------------------
def _tile(n_pad, preferred):
    """Largest (multiple-of-128) tile that divides the padded extent."""
    preferred = 128 * pl.cdiv(max(preferred, 128), 128)
    return math.gcd(n_pad, preferred)


def graph_convolution(x, weight, adj, bias=None, *, row_tile=256, k_tile=512,
                      support_row_tile=512):
    """Pallas implementation of GraphConvolution.forward (dense adjacency)."""
    n, in_features = x.shape
    out_features = weight.shape[1]

    # Lane-dense output width (unmasked vst, full 128-wide MXU result tiles).
    out_pad = 128 * pl.cdiv(out_features, 128)
    # Node axis padded to a multiple of 128 so tiles stay (8,128)-aligned and
    # divide evenly; zero rows/cols contribute nothing to the aggregation.
    n_pad = 128 * pl.cdiv(n, 128)

    # --- wrapper-side prep (small arrays only; adj is NOT cast here) ---------
    w_p = jnp.pad(weight, ((0, 0), (0, out_pad - out_features))).astype(jnp.bfloat16)
    if bias is None:
        b_p = jnp.zeros((1, out_pad), jnp.float32)
    else:
        b_p = jnp.pad(bias.astype(jnp.float32),
                      (0, out_pad - out_features)).reshape(1, out_pad)
    x_p = jnp.pad(x, ((0, n_pad - n), (0, 0))) if n_pad != n else x
    adj_p = (jnp.pad(adj, ((0, n_pad - n), (0, n_pad - n)))
             if n_pad != n else adj)

    out_dtype = x.dtype

    # --- tile selection -------------------------------------------------------
    tm = _tile(n_pad, row_tile)
    if tm == n_pad and n_pad % 256 == 0:
        tm = n_pad // 2          # >= 2 row blocks so v7x megacore gets both TCs busy
    tk = _tile(n_pad, k_tile)
    ts = _tile(n_pad, support_row_tile)

    vmem_limit = 48 * 1024 * 1024   # explicit scoped-VMEM limit (<= v7x physical)

    # --- kernel 1: support = x @ W (one pass, large row tile, lane-dense) ----
    support = pl.pallas_call(
        support_kernel,
        out_shape=jax.ShapeDtypeStruct((n_pad, out_pad), jnp.bfloat16),
        grid_spec=pltpu.PrefetchScalarGridSpec(
            num_scalar_prefetch=0,
            grid=(n_pad // ts,),
            in_specs=[
                pl.BlockSpec((ts, in_features), lambda i: (i, 0)),
                pl.BlockSpec((in_features, out_pad), lambda i: (0, 0)),
            ],
            out_specs=pl.BlockSpec((ts, out_pad), lambda i: (i, 0)),
        ),
        compiler_params=pltpu.CompilerParams(
            dimension_semantics=("parallel",),
            vmem_limit_bytes=vmem_limit,
        ),
        cost_estimate=pl.CostEstimate(
            flops=2 * n_pad * in_features * out_pad,
            transcendentals=0,
            bytes_accessed=(n_pad * in_features * x_p.dtype.itemsize
                            + in_features * out_pad * 2
                            + n_pad * out_pad * 2),
        ),
    )(x_p, w_p)

    # --- kernel 2: output = adj @ support + bias, K-tiled with f32 accumulator
    out_p = pl.pallas_call(
        aggregate_kernel,
        out_shape=jax.ShapeDtypeStruct((n_pad, out_pad), out_dtype),
        grid_spec=pltpu.PrefetchScalarGridSpec(
            num_scalar_prefetch=0,
            grid=(n_pad // tm, n_pad // tk),
            in_specs=[
                pl.BlockSpec((tm, tk), lambda i, k: (i, k)),        # adj (streamed)
                pl.BlockSpec((tk, out_pad), lambda i, k: (k, 0)),   # support tiles
                pl.BlockSpec((1, out_pad), lambda i, k: (0, 0)),    # bias (tiny)
            ],
            out_specs=pl.BlockSpec((tm, out_pad), lambda i, k: (i, 0)),
            scratch_shapes=[pltpu.VMEM((tm, out_pad), jnp.float32)],
        ),
        compiler_params=pltpu.CompilerParams(
            dimension_semantics=("parallel", "arbitrary"),
            vmem_limit_bytes=vmem_limit,
        ),
        cost_estimate=pl.CostEstimate(
            flops=2 * n_pad * n_pad * out_pad,
            transcendentals=0,
            bytes_accessed=(n_pad * n_pad * adj_p.dtype.itemsize
                            + n_pad * out_pad * 2
                            + out_pad * 4
                            + n_pad * out_pad * jnp.dtype(out_dtype).itemsize),
        ),
    )(adj_p, support, b_p)

    # Only the padding slice remains; the result is already in the caller's
    # dtype (downstream layers could consume the padded slab directly).
    return out_p[:n, :out_features]


def init_params(key, in_features, out_features):
    """Deterministic init mirroring GraphConvolution.reset_parameters."""
    stdv = 1.0 / math.sqrt(out_features)
    kw, kb = jax.random.split(key)
    weight = jax.random.uniform(
        kw, (in_features, out_features), jnp.float32, minval=-stdv, maxval=stdv
    )
    bias = jax.random.uniform(
        kb, (out_features,), jnp.float32, minval=-stdv, maxval=stdv
    )
    return weight, bias


if __name__ == "__main__":
    key = jax.random.PRNGKey(0)
    k_x, k_adj, k_p = jax.random.split(key, 3)

    N = 200            # deliberately NOT a multiple of 128 -> exercises padding
    IN_FEATURES = 64
    OUT_FEATURES = 32

    # Node features
    x = jax.random.normal(k_x, (N, IN_FEATURES), jnp.float32)

    # Dense row-normalized adjacency (self-loops + random edges), kept in f32;
    # the kernel casts it to bf16 in-VMEM (no extra HBM pass).
    raw = (jax.random.uniform(k_adj, (N, N)) > 0.9).astype(jnp.float32)
    raw = raw + jnp.eye(N, dtype=jnp.float32)
    deg = jnp.sum(raw, axis=1, keepdims=True)
    adj = raw / deg

    weight, bias = init_params(k_p, IN_FEATURES, OUT_FEATURES)

    # Small tiles here so the demo exercises multiple row blocks AND the K
    # accumulation path; production defaults are row_tile=256 / k_tile=512.
    out = graph_convolution(x, weight, adj, bias, row_tile=128, k_tile=128)
    out = jax.block_until_ready(out)
    assert out.shape == (N, OUT_FEATURES)
    assert out.dtype == x.dtype

    # Reference 1: same cast points as the kernel (bf16 operands, f32 acc).
    sup_ref = jnp.dot(
        x.astype(jnp.bfloat16), weight.astype(jnp.bfloat16),
        preferred_element_type=jnp.float32,
    ).astype(jnp.bfloat16)
    ref_bf = jnp.dot(
        adj.astype(jnp.bfloat16), sup_ref, preferred_element_type=jnp.float32
    ) + bias[None, :]
    assert jnp.allclose(out, ref_bf, atol=1e-2, rtol=1e-2), "mismatch vs bf16 reference"

    # Reference 2: full-f32 module semantics (loose tolerance for bf16 operands).
    ref_f32 = adj @ (x @ weight) + bias[None, :]
    assert jnp.allclose(out, ref_f32, atol=5e-2, rtol=5e-2), "mismatch vs f32 reference"

    print("KERNEL_OK")
</pallas_src>

<mosaic_0001>
module attributes {stable_mosaic.version = 11 : i64} {
  func.func @support_kernel(%arg0: i32, %arg1: memref<256x64xf32, #tpu.memory_space<vmem>>, %arg2: memref<64x128xbf16, #tpu.memory_space<vmem>>, %arg3: memref<256x128xbf16, #tpu.memory_space<vmem>>) attributes {dimension_semantics = [#tpu.dimension_semantics<parallel>], iteration_bounds = array<i64: 1>, scalar_prefetch = 0 : i64, scratch_operands = 0 : i64, tpu.core_type = #tpu.core_type<tc>, window_params = [{transform_indices = @transform_0, window_bounds = array<i64: 256, 64>}, {pipeline_mode = #tpu.pipeline_mode<synchronous>, transform_indices = @transform_1, window_bounds = array<i64: 64, 128>}, {transform_indices = @transform_2, window_bounds = array<i64: 256, 128>}]} {
    %c0 = arith.constant 0 : index
    %c0_0 = arith.constant 0 : index
    %0 = vector.load %arg1[%c0, %c0_0] : memref<256x64xf32, #tpu.memory_space<vmem>>, vector<256x64xf32>
    %1 = arith.truncf %0 : vector<256x64xf32> to vector<256x64xbf16>
    %c0_1 = arith.constant 0 : index
    %c0_2 = arith.constant 0 : index
    %2 = vector.load %arg2[%c0_1, %c0_2] : memref<64x128xbf16, #tpu.memory_space<vmem>>, vector<64x128xbf16>
    %cst = arith.constant dense<0.000000e+00> : vector<256x128xf32>
    %3 = tpu.matmul %1, %2, %cst {dimension_numbers = #tpu.dot_dimension_numbers<[1], [0], [0], [1], [0, 0, 1, 1], [], []>} : vector<256x64xbf16>, vector<64x128xbf16>, vector<256x128xf32> -> vector<256x128xf32>
    %4 = arith.truncf %3 : vector<256x128xf32> to vector<256x128xbf16>
    %c0_3 = arith.constant 0 : index
    %c0_4 = arith.constant 0 : index
    %5 = vector.load %arg3[%c0_3, %c0_4] : memref<256x128xbf16, #tpu.memory_space<vmem>>, vector<256x128xbf16>
    tpu.vector_store %arg3[%c0_3, %c0_4], %4 {strides = array<i32>} : memref<256x128xbf16, #tpu.memory_space<vmem>>, vector<256x128xbf16>,
    return
  }
  func.func @transform_0(%arg0: i32) -> (i32, i32) {
    %c0_i32 = arith.constant 0 : i32
    %c0_i32_0 = arith.constant 0 : i32
    return %arg0, %c0_i32 : i32, i32
  }
  func.func @transform_1(%arg0: i32) -> (i32, i32) {
    %c0_i32 = arith.constant 0 : i32
    %c0_i32_0 = arith.constant 0 : i32
    %c0_i32_1 = arith.constant 0 : i32
    return %c0_i32, %c0_i32_0 : i32, i32
  }
  func.func @transform_2(%arg0: i32) -> (i32, i32) {
    %c0_i32 = arith.constant 0 : i32
    %c0_i32_0 = arith.constant 0 : i32
    return %arg0, %c0_i32 : i32, i32
  }
}

</mosaic_0001>

<bundles_post_ra>
// kernel: tpu_custom_call.1
= control target key start
LH: loop header
LB: loop body
LE: loop exit
PB: predicated region body
PF: predicated region fallthrough
CT: control target
= control target key end

     0   :  { %s630_s0 = inlined_call_operand.vmem [shape: f32[256,64], index: 0, kind: input, shape index: {}]   ;;  %s631_s1 = inlined_call_operand.vmem [shape: bf16[64,128], index: 1, kind: input, shape index: {}]   ;;  %s632_s2 = inlined_call_operand.hbm [shape: bf16[256,128], index: 2, kind: output, shape index: {}]  }
   0x1   :  { %v348_v0 = vld [vmem:[%s631_s1 + $0x18] sm:$0xff]  ;;  %v347_v1 = vld [vmem:[%s631_s1 + $0x10] sm:$0xff]  ;;  %v346_v2 = vld [vmem:[%s631_s1 + $0x8] sm:$0xff] }
   0x2   :  { %146 = vmatpush.bf16.msra.mxu0 %v348_v0  ;;  %444 = vmatpush.bf16.msra.mxu1 %v348_v0 }
   0x3   :  { %445 = vmatpush.bf16.msra.mxu2 %v348_v0  ;;  %446 = vmatpush.bf16.msra.mxu3 %v348_v0 }
   0x6   :  { %147 = vmatpush.bf16.msra.mxu0 %v347_v1  ;;  %447 = vmatpush.bf16.msra.mxu1 %v347_v1 }
   0x7   :  { %448 = vmatpush.bf16.msra.mxu2 %v347_v1  ;;  %449 = vmatpush.bf16.msra.mxu3 %v347_v1 }
   0x8   :  { %7 = vsyncpa [#allocation3], 0  ;;  %v345_v3 = vld [vmem:[%s631_s1] sm:$0xff]  ;;  %v14_v5 = vld [vmem:[%s630_s0 + $0x8] sm:$0xff]  ;;  %vm93_vm0 = vcmask 523264   ;;  %s301_s1 = sshll.u32 %s632_s2, 4  ;;  %s302_s1 = int_to_ptr.hbm [resolvable:$true] %s301_s1 }
   0x9   :  { %v13_v4 = vld [vmem:[%s630_s0] sm:$0xff]  ;;  %v22_v7 = vld [vmem:[%s630_s0 + $0x48] sm:$0xff]  ;;  %v15_v16 = vld [vmem:[%s630_s0 + $0x10] sm:$0xff]  ;;  %s486_s26 = smov 64   ;;  %s487_s27 = smov 4  }
   0xa   :  { %148 = vmatpush.bf16.msra.mxu0 %v346_v2  ;;  %450 = vmatpush.bf16.msra.mxu1 %v346_v2  ;;  %v21_v6 = vld [vmem:[%s630_s0 + $0x40] sm:$0xff]  ;;  %v30_v9 = vld [vmem:[%s630_s0 + $0x88] sm:$0xff]  ;;  %v45_v12 = vpack.c.bf16 %v14_v5, %v13_v4  ;;  %v16_v17 = vld [vmem:[%s630_s0 + $0x18] sm:$0xff] }
   0xb   :  { %v29_v8 = vld [vmem:[%s630_s0 + $0x80] sm:$0xff]  ;;  %451 = vmatpush.bf16.msra.mxu2 %v346_v2  ;;  %452 = vmatpush.bf16.msra.mxu3 %v346_v2  ;;  %v38_v11 = vld [vmem:[%s630_s0 + $0xc8] sm:$0xff]  ;;  %v49_v13 = vpack.c.bf16 %v22_v7, %v21_v6  ;;  %v23_v18 = vld [vmem:[%s630_s0 + $0x50] sm:$0xff]  ;;  %v46_v24 = vpack.c.bf16 %v16_v17, %v15_v16 }
   0xc   :  { %v37_v10 = vld [vmem:[%s630_s0 + $0xc0] sm:$0xff]  ;;  %v53_v14 = vpack.c.bf16 %v30_v9, %v29_v8  ;;  %v24_v19 = vld [vmem:[%s630_s0 + $0x58] sm:$0xff]  ;;  %v31_v20 = vld [vmem:[%s630_s0 + $0x90] sm:$0xff] }
   0xd   :  { %v57_v15 = vpack.c.bf16 %v38_v11, %v37_v10  ;;  %v32_v21 = vld [vmem:[%s630_s0 + $0x98] sm:$0xff]  ;;  %v39_v22 = vld [vmem:[%s630_s0 + $0xd0] sm:$0xff]  ;;  %v50_v25 = vpack.c.bf16 %v24_v19, %v23_v18  ;;  %v17_v28 = vld [vmem:[%s630_s0 + $0x20] sm:$0xff] }
   0xe   :  { %149 = vmatpush.bf16.msra.mxu0 %v345_v3  ;;  %453 = vmatpush.bf16.msra.mxu1 %v345_v3  ;;  %v40_v23 = vld [vmem:[%s630_s0 + $0xd8] sm:$0xff]  ;;  %v54_v26 = vpack.c.bf16 %v32_v21, %v31_v20  ;;  %v18_v29 = vld [vmem:[%s630_s0 + $0x28] sm:$0xff]  ;;  %v25_v30 = vld [vmem:[%s630_s0 + $0x60] sm:$0xff] }
   0xf   :  { %454 = vmatpush.bf16.msra.mxu2 %v345_v3  ;;  %455 = vmatpush.bf16.msra.mxu3 %v345_v3  ;;  %v58_v27 = vpack.c.bf16 %v40_v23, %v39_v22  ;;  %v26_v31 = vld [vmem:[%s630_s0 + $0x68] sm:$0xff]  ;;  %v33_v32 = vld [vmem:[%s630_s0 + $0xa0] sm:$0xff]  ;;  %v47_v36 = vpack.c.bf16 %v18_v29, %v17_v28  ;;  %v19_v40 = vld [vmem:[%s630_s0 + $0x30] sm:$0xff] }
  0x10   :  { %v34_v33 = vld [vmem:[%s630_s0 + $0xa8] sm:$0xff]  ;;  %v41_v34 = vld [vmem:[%s630_s0 + $0xe0] sm:$0xff]  ;;  %v51_v37 = vpack.c.bf16 %v26_v31, %v25_v30  ;;  %v20_v41 = vld [vmem:[%s630_s0 + $0x38] sm:$0xff] }
  0x11   :  { %329 = vmatmul.msk.bf16.vlgmr.msra.gmra.mxu0 %vm93_vm0, %v45_v12  ;;  %333 = vmatmul.msk.bf16.vlgmr.msra.gmra.mxu1 %vm93_vm0, %v49_v13  ;;  %v42_v35 = vld [vmem:[%s630_s0 + $0xe8] sm:$0xff]  ;;  %v55_v38 = vpack.c.bf16 %v34_v33, %v33_v32  ;;  %v27_v42 = vld [vmem:[%s630_s0 + $0x70] sm:$0xff]  ;;  %v28_v43 = vld [vmem:[%s630_s0 + $0x78] sm:$0xff]  ;;  %v48_v48 = vpack.c.bf16 %v20_v41, %v19_v40 }
  0x12   :  { %337 = vmatmul.msk.bf16.vlgmr.msra.gmra.mxu2 %vm93_vm0, %v53_v14  ;;  %341 = vmatmul.msk.bf16.vlgmr.msra.gmra.mxu3 %vm93_vm0, %v57_v15  ;;  %v59_v39 = vpack.c.bf16 %v42_v35, %v41_v34  ;;  %v35_v44 = vld [vmem:[%s630_s0 + $0xb0] sm:$0xff]  ;;  %v36_v45 = vld [vmem:[%s630_s0 + $0xb8] sm:$0xff]  ;;  %v52_v49 = vpack.c.bf16 %v28_v43, %v27_v42 }
  0x13   :  { %v43_v46 = vld [vmem:[%s630_s0 + $0xf0] sm:$0xff]  ;;  %v44_v47 = vld [vmem:[%s630_s0 + $0xf8] sm:$0xff]  ;;  %v56_v50 = vpack.c.bf16 %v36_v45, %v35_v44  ;;  %s485_s0 = smov [#allocation2]  }
  0x14   :  { %v60_v51 = vpack.c.bf16 %v44_v47, %v43_v46  ;;  %s299_s23 = sshll.u32 %s485_s0, 4  ;;  %s300_s23 = int_to_ptr.vmem [resolvable:$true] %s299_s23 }
  0x21   :  { %330 = vmatmul.msk.bf16.gmra.mxu0 %vm93_vm0, %v46_v24  ;;  %334 = vmatmul.msk.bf16.gmra.mxu1 %vm93_vm0, %v50_v25 }
  0x22   :  { %338 = vmatmul.msk.bf16.gmra.mxu2 %vm93_vm0, %v54_v26  ;;  %342 = vmatmul.msk.bf16.gmra.mxu3 %vm93_vm0, %v58_v27 }
  0x31   :  { %331 = vmatmul.msk.bf16.gmra.mxu0 %vm93_vm0, %v47_v36  ;;  %335 = vmatmul.msk.bf16.gmra.mxu1 %vm93_vm0, %v51_v37 }
  0x32   :  { %339 = vmatmul.msk.bf16.gmra.mxu2 %vm93_vm0, %v55_v38  ;;  %343 = vmatmul.msk.bf16.gmra.mxu3 %vm93_vm0, %v59_v39 }
  0x41   :  { %332 = vmatmul.msk.bf16.gmra.mxu0 %vm93_vm0, %v48_v48  ;;  %336 = vmatmul.msk.bf16.gmra.mxu1 %vm93_vm0, %v52_v49 }
  0x42   :  { %340 = vmatmul.msk.bf16.gmra.mxu2 %vm93_vm0, %v56_v50  ;;  %344 = vmatmul.msk.bf16.gmra.mxu3 %vm93_vm0, %v60_v51 }
  0x8e   :  { %v151_v52 = vpop.f32.mrf.mxu0  ;;  %v171_v53 = vpop.f32.mrf.mxu1 }
  0x95   :  { %v191_v54 = vpop.f32.mrf.mxu2  ;;  %v211_v55 = vpop.f32.mrf.mxu3 }
  0x96   :  { %v153_v56 = vpop.f32.mrf.mxu0  ;;  %v173_v57 = vpop.f32.mrf.mxu1 }
  0x97   :  { %v352_v58 = vpack.c.bf16 %v153_v56, %v151_v52  ;;  %v372_v59 = vpack.c.bf16 %v173_v57, %v171_v53 }
  0x99   :  { %353 = vst [vmem:[#allocation2] sm:$0xff] %v352_v58  }
  0x9a   :  { %432 = vst [vmem:[#allocation2 + $0x20] sm:$0xff] %v372_v59  }
  0x9d   :  { %v193_v60 = vpop.f32.mrf.mxu2  ;;  %v213_v61 = vpop.f32.mrf.mxu3 }
  0x9e   :  { %v392_v62 = vpack.c.bf16 %v193_v60, %v191_v54  ;;  %v412_v63 = vpack.c.bf16 %v213_v61, %v211_v55  ;;  %v156_v0 = vpop.f32.mrf.mxu0  ;;  %v176_v1 = vpop.f32.mrf.mxu1 }
  0xa0   :  { %436 = vst [vmem:[#allocation2 + $0x40] sm:$0xff] %v392_v62  }
  0xa1   :  { %440 = vst [vmem:[#allocation2 + $0x60] sm:$0xff] %v412_v63  }
  0xa5   :  { %v196_v2 = vpop.f32.mrf.mxu2  ;;  %v216_v3 = vpop.f32.mrf.mxu3 }
  0xa6   :  { %v158_v4 = vpop.f32.mrf.mxu0  ;;  %v178_v5 = vpop.f32.mrf.mxu1 }
  0xa7   :  { %v357_v6 = vpack.c.bf16 %v158_v4, %v156_v0  ;;  %v377_v7 = vpack.c.bf16 %v178_v5, %v176_v1 }
  0xa9   :  { %429 = vst [vmem:[#allocation2 + $0x8] sm:$0xff] %v357_v6  }
  0xaa   :  { %433 = vst [vmem:[#allocation2 + $0x28] sm:$0xff] %v377_v7  }
  0xad   :  { %v198_v8 = vpop.f32.mrf.mxu2  ;;  %v218_v9 = vpop.f32.mrf.mxu3 }
  0xae   :  { %v397_v10 = vpack.c.bf16 %v198_v8, %v196_v2  ;;  %v417_v11 = vpack.c.bf16 %v218_v9, %v216_v3  ;;  %v161_v12 = vpop.f32.mrf.mxu0  ;;  %v181_v13 = vpop.f32.mrf.mxu1 }
  0xb0   :  { %437 = vst [vmem:[#allocation2 + $0x48] sm:$0xff] %v397_v10  }
  0xb1   :  { %441 = vst [vmem:[#allocation2 + $0x68] sm:$0xff] %v417_v11  }
  0xb5   :  { %v201_v14 = vpop.f32.mrf.mxu2  ;;  %v221_v15 = vpop.f32.mrf.mxu3 }
  0xb6   :  { %v163_v16 = vpop.f32.mrf.mxu0  ;;  %v183_v17 = vpop.f32.mrf.mxu1 }
  0xb7   :  { %v362_v18 = vpack.c.bf16 %v163_v16, %v161_v12  ;;  %v382_v19 = vpack.c.bf16 %v183_v17, %v181_v13 }
  0xb9   :  { %430 = vst [vmem:[#allocation2 + $0x10] sm:$0xff] %v362_v18  }
  0xba   :  { %434 = vst [vmem:[#allocation2 + $0x30] sm:$0xff] %v382_v19  }
  0xbd   :  { %v203_v20 = vpop.f32.mrf.mxu2  ;;  %v223_v21 = vpop.f32.mrf.mxu3 }
  0xbe   :  { %v402_v22 = vpack.c.bf16 %v203_v20, %v201_v14  ;;  %v422_v23 = vpack.c.bf16 %v223_v21, %v221_v15  ;;  %v166_v24 = vpop.f32.mrf.mxu0  ;;  %v186_v25 = vpop.f32.mrf.mxu1 }
  0xc0   :  { %438 = vst [vmem:[#allocation2 + $0x50] sm:$0xff] %v402_v22  }
  0xc1   :  { %442 = vst [vmem:[#allocation2 + $0x70] sm:$0xff] %v422_v23  }
  0xc5   :  { %v206_v26 = vpop.f32.mrf.mxu2  ;;  %v226_v27 = vpop.f32.mrf.mxu3 }
  0xc6   :  { %v168_v28 = vpop.f32.mrf.mxu0  ;;  %v188_v29 = vpop.f32.mrf.mxu1 }
  0xc7   :  { %v367_v30 = vpack.c.bf16 %v168_v28, %v166_v24  ;;  %v387_v31 = vpack.c.bf16 %v188_v29, %v186_v25 }
  0xc9   :  { %431 = vst [vmem:[#allocation2 + $0x18] sm:$0xff] %v367_v30  }
  0xca   :  { %435 = vst [vmem:[#allocation2 + $0x38] sm:$0xff] %v387_v31  }
  0xcd   :  { %v208_v32 = vpop.f32.mrf.mxu2  ;;  %v228_v33 = vpop.f32.mrf.mxu3 }
  0xce   :  { %v407_v34 = vpack.c.bf16 %v208_v32, %v206_v26  ;;  %v427_v35 = vpack.c.bf16 %v228_v33, %v226_v27 }
  0xd0   :  { %439 = vst [vmem:[#allocation2 + $0x58] sm:$0xff] %v407_v34  }
  0xd1   :  { %443 = vst [vmem:[#allocation2 + $0x78] sm:$0xff] %v427_v35  }
  0xd2   :  { %307 = dma.vmem_to_hbm [thread:$0]  %s300_s23, 2048, %s302_s1, [#allocation3], %s486_s26, %s486_s26, %s487_s27  }
  0xd3   :  { %483 = dma.done.wait [#allocation3], 2048  }
  0xd4   :  { %484 = vsyncadd [#allocation3], 4294965248 }
  0xd5   :  { %312 = vsyncpa [#allocation3], 1 }

</bundles_post_ra>
